<compile_context>
chip_gen: v7x
topology: tpu7x:2x2x1
jax: 0.10.0
libtpu: 0.0.40
codegen_flags: <defaults>
</compile_context>

<pallas_src>
import math

import jax
import jax.numpy as jnp
from jax.experimental import pallas as pl
from jax.experimental.pallas import tpu as pltpu


_INV_SQRT2 = 0.7071067811865476


def _erf(x):
    # Abramowitz & Stegun 7.1.26 rational approximation, |err| <= 1.5e-7.
    # add/mul on VPU, exp + reciprocal on the EUP slot.
    a1, a2, a3, a4, a5 = (0.254829592, -0.284496736, 1.421413741,
                          -1.453152027, 1.061405429)
    p = 0.3275911
    ax = jnp.abs(x)
    t = pl.reciprocal(1.0 + p * ax, approx=True)
    poly = ((((a5 * t + a4) * t + a3) * t + a2) * t + a1) * t
    y = 1.0 - poly * jnp.exp(-ax * ax)
    return jnp.where(x >= 0.0, y, -y)


def _gelu_exact(x):
    # torch.nn.GELU() default (erf form).
    return 0.5 * x * (1.0 + _erf(x * _INV_SQRT2))


def _ffn_kernel(x_ref, w1_ref, b1_ref, w2_ref, b2_ref, o_ref, acc_ref):
    # x: [tm, din] f32, w1: [din, th] bf16, b1: [1, th] f32,
    # w2: [th, dout_pad] bf16, b2: [1, dout_pad] f32, acc: [tm, dout_pad] f32.
    j = pl.program_id(1)

    @pl.when(j == 0)
    def _():
        acc_ref[...] = jnp.zeros_like(acc_ref)

    h = jnp.dot(x_ref[...].astype(jnp.bfloat16), w1_ref[...],
                preferred_element_type=jnp.float32) + b1_ref[...]
    h = _gelu_exact(h)
    acc_ref[...] += jnp.dot(h.astype(jnp.bfloat16), w2_ref[...],
                            preferred_element_type=jnp.float32)

    @pl.when(j == pl.num_programs(1) - 1)
    def _():
        o_ref[...] = (acc_ref[...] + b2_ref[...]).astype(o_ref.dtype)


def _round_up(x, m):
    return ((x + m - 1) // m) * m


def _pick_divisor(total, cap):
    # Largest divisor of `total` that is <= cap (>= 1).
    d = max(1, min(cap, total))
    while total % d:
        d -= 1
    return d


def _choose_tm(m, block_m):
    if m <= 8:
        return 8
    # >= 2 grid steps so the 'parallel' axis can shard across both v7x cores.
    half = -(-m // 2)
    tm = min(block_m, _round_up(half, 8))
    if tm >= 256:
        tm = (tm // 256) * 256      # v6e/v7x MXU-friendly rows
    elif tm >= 128:
        tm = (tm // 128) * 128      # v5e MXU-friendly rows
    return tm


def _vmem_estimate(tm, th, din, dout_p):
    return (2 * tm * din * 4          # x tile (f32), double buffered
            + 2 * din * th * 2        # W1^T tile (bf16)
            + 2 * th * 4              # b1 tile
            + 2 * th * dout_p * 2     # W2^T tile (bf16)
            + dout_p * 4              # b2
            + 2 * tm * dout_p * 4     # out tile (f32), double buffered
            + tm * dout_p * 4         # f32 accumulator scratch
            + tm * th * 4)            # hidden activation tile (f32)


def feed_forward(x, params, *, block_m=512, block_h=512):
    """x: [..., dim] -> [..., dim_out].  Single fused pallas_call."""
    w1t, b1, w2t, b2 = params["w1t"], params["b1"], params["w2t"], params["b2"]
    din, dh_pad = w1t.shape
    dout_pad = w2t.shape[1]
    dout = params["dim_out"]

    lead = x.shape[:-1]
    x2 = x.reshape(-1, din).astype(jnp.float32)
    m = x2.shape[0]

    tm = _choose_tm(m, block_m)
    max_h_units = max(1, min(block_h, dh_pad) // 128)
    th = 128 * _pick_divisor(dh_pad // 128, max_h_units)

    # Conservative budget sized for v7x (64 MiB physical VMEM).
    budget = 40 * 1024 * 1024
    while _vmem_estimate(tm, th, din, dout_pad) > budget and th > 128:
        max_h_units = max(1, max_h_units // 2)
        th = 128 * _pick_divisor(dh_pad // 128, max_h_units)
    while _vmem_estimate(tm, th, din, dout_pad) > budget and tm > 8:
        tm = max(8, _round_up(tm // 2, 8))

    grid_m = pl.cdiv(m, tm)
    grid_h = dh_pad // th
    est = _vmem_estimate(tm, th, din, dout_pad)
    vmem_limit = int(min(48 * 2**20, max(2 * est, 16 * 2**20)))

    def build(single_buffer_consts):
        # b2 is constant over the whole grid; weights/b1 are also constant
        # when the hidden dim fits in a single chunk -> single-buffer them.
        w_const = single_buffer_consts and grid_h == 1

        def spec(shape, index_map, const):
            if const:
                return pl.BlockSpec(shape, index_map,
                                    pipeline_mode=pl.Buffered(1))
            return pl.BlockSpec(shape, index_map)

        in_specs = [
            pl.BlockSpec((tm, din), lambda i, j: (i, 0)),            # x rows
            spec((din, th), lambda i, j: (0, j), w_const),           # W1^T
            spec((1, th), lambda i, j: (0, j), w_const),             # b1
            spec((th, dout_pad), lambda i, j: (j, 0), w_const),      # W2^T
            spec((1, dout_pad), lambda i, j: (0, 0),
                 single_buffer_consts),                              # b2
        ]
        return pl.pallas_call(
            _ffn_kernel,
            out_shape=jax.ShapeDtypeStruct((m, dout_pad), jnp.float32),
            grid=(grid_m, grid_h),
            in_specs=in_specs,
            out_specs=pl.BlockSpec((tm, dout_pad), lambda i, j: (i, 0)),
            scratch_shapes=[pltpu.VMEM((tm, dout_pad), jnp.float32)],
            compiler_params=pltpu.CompilerParams(
                dimension_semantics=("parallel", "arbitrary"),
                vmem_limit_bytes=vmem_limit),
        )

    try:
        out = build(True)(x2, w1t, b1, w2t, b2)
    except Exception:
        # Fallback if this JAX build rejects pipeline_mode=pl.Buffered(1).
        out = build(False)(x2, w1t, b1, w2t, b2)

    if dout_pad != dout:
        out = out[:, :dout]
    return out.reshape(*lead, dout)


def init_ffn_params(key, dim, dim_out=None, mult=4):
    """Kernel-friendly layout: W as bf16 [Din, Dout_padded], b as f32 [1, D].

    Hidden and output feature dims are zero-padded up to multiples of 128 so
    all kernel loads/stores along the lane axis are dense; the zero padding is
    mathematically inert (GELU(0)=0 and zero W2 rows/columns contribute 0).
    """
    dim_out = dim if dim_out is None else dim_out
    hidden = dim * mult
    dh_pad = _round_up(hidden, 128)
    dout_pad = _round_up(dim_out, 128)

    k1, k2, k3, k4 = jax.random.split(key, 4)
    lim1 = 1.0 / math.sqrt(dim)       # torch.nn.Linear default init bounds
    lim2 = 1.0 / math.sqrt(hidden)

    w1 = jax.random.uniform(k1, (dim, hidden), jnp.float32, -lim1, lim1)
    b1 = jax.random.uniform(k2, (1, hidden), jnp.float32, -lim1, lim1)
    w2 = jax.random.uniform(k3, (hidden, dim_out), jnp.float32, -lim2, lim2)
    b2 = jax.random.uniform(k4, (1, dim_out), jnp.float32, -lim2, lim2)

    w1t = jnp.zeros((dim, dh_pad), jnp.float32).at[:, :hidden].set(w1)
    b1p = jnp.zeros((1, dh_pad), jnp.float32).at[:, :hidden].set(b1)
    w2t = jnp.zeros((dh_pad, dout_pad), jnp.float32).at[:hidden, :dim_out].set(w2)
    b2p = jnp.zeros((1, dout_pad), jnp.float32).at[:, :dim_out].set(b2)

    return {
        "w1t": w1t.astype(jnp.bfloat16),
        "b1": b1p,
        "w2t": w2t.astype(jnp.bfloat16),
        "b2": b2p,
        "dim_out": dim_out,
    }


def _reference(x, params):
    # Pure-JAX reference emulating the kernel's precision (bf16 matmul inputs,
    # f32 accumulation) but using the exact lax.erf GELU.
    w1 = params["w1t"].astype(jnp.float32)
    w2 = params["w2t"].astype(jnp.float32)
    xb = x.astype(jnp.bfloat16).astype(jnp.float32)
    h = xb @ w1 + params["b1"]
    h = 0.5 * h * (1.0 + jax.lax.erf(h * _INV_SQRT2))
    hb = h.astype(jnp.bfloat16).astype(jnp.float32)
    out = hb @ w2 + params["b2"]
    return out[:, :params["dim_out"]]


if __name__ == "__main__":
    key = jax.random.PRNGKey(0)
    kx, kx2, kp = jax.random.split(key, 3)

    B, S, DIM, MULT = 2, 8, 32, 4          # hidden = 128, dim_out = dim = 32
    params = init_ffn_params(kp, DIM, None, MULT)

    # Main case: m = 16 rows -> 2 row tiles (exercises the parallel axis).
    x = jax.random.normal(kx, (B, S, DIM), jnp.float32)
    out = feed_forward(x, params)
    jax.block_until_ready(out)
    assert out.shape == (B, S, DIM)
    ref = _reference(x.reshape(-1, DIM), params).reshape(B, S, DIM)
    max_err = float(jnp.max(jnp.abs(out - ref)))
    assert max_err < 1e-2, f"mismatch vs reference: {max_err}"

    # Ragged case: m = 15 rows -> partial tail tile handled without jnp.pad.
    x_tail = jax.random.normal(kx2, (3, 5, DIM), jnp.float32)
    out_tail = feed_forward(x_tail, params)
    jax.block_until_ready(out_tail)
    assert out_tail.shape == (3, 5, DIM)
    ref_tail = _reference(x_tail.reshape(-1, DIM), params).reshape(3, 5, DIM)
    max_err_tail = float(jnp.max(jnp.abs(out_tail - ref_tail)))
    assert max_err_tail < 1e-2, f"tail mismatch vs reference: {max_err_tail}"

    print("KERNEL_OK")
</pallas_src>

<mosaic_0001>
module attributes {stable_mosaic.version = 11 : i64} {
  func.func @_ffn_kernel(%arg0: i32, %arg1: i32, %arg2: memref<8x32xf32, #tpu.memory_space<vmem>>, %arg3: memref<32x128xbf16, #tpu.memory_space<vmem>>, %arg4: memref<1x128xf32, #tpu.memory_space<vmem>>, %arg5: memref<128x128xbf16, #tpu.memory_space<vmem>>, %arg6: memref<1x128xf32, #tpu.memory_space<vmem>>, %arg7: memref<8x128xf32, #tpu.memory_space<vmem>>, %arg8: memref<8x128xf32, #tpu.memory_space<vmem>>) attributes {dimension_semantics = [#tpu.dimension_semantics<parallel>, #tpu.dimension_semantics<arbitrary>], iteration_bounds = array<i64: 2, 1>, scalar_prefetch = 0 : i64, scratch_operands = 1 : i64, tpu.core_type = #tpu.core_type<tc>, window_params = [{transform_indices = @transform_0, window_bounds = array<i64: 8, 32>}, {pipeline_mode = #tpu.pipeline_mode<synchronous>, transform_indices = @transform_1, window_bounds = array<i64: 32, 128>}, {pipeline_mode = #tpu.pipeline_mode<synchronous>, transform_indices = @transform_2, window_bounds = array<i64: 1, 128>}, {pipeline_mode = #tpu.pipeline_mode<synchronous>, transform_indices = @transform_3, window_bounds = array<i64: 128, 128>}, {pipeline_mode = #tpu.pipeline_mode<synchronous>, transform_indices = @transform_4, window_bounds = array<i64: 1, 128>}, {transform_indices = @transform_5, window_bounds = array<i64: 8, 128>}]} {
    %c0_i32 = arith.constant 0 : i32
    %0 = arith.cmpi eq, %arg1, %c0_i32 : i32
    %1 = arith.extui %0 : i1 to i32
    %c0_i32_0 = arith.constant 0 : i32
    %2 = arith.cmpi ne, %1, %c0_i32_0 : i32
    scf.if %2 {
      %cst_29 = arith.constant 0.000000e+00 : f32
      %58 = vector.broadcast %cst_29 : f32 to vector<8x128xf32>
      %c0_30 = arith.constant 0 : index
      %c0_31 = arith.constant 0 : index
      %59 = vector.load %arg8[%c0_30, %c0_31] : memref<8x128xf32, #tpu.memory_space<vmem>>, vector<8x128xf32>
      tpu.vector_store %arg8[%c0_30, %c0_31], %58 {strides = array<i32>} : memref<8x128xf32, #tpu.memory_space<vmem>>, vector<8x128xf32>,
    } else {
    }
    %c0 = arith.constant 0 : index
    %c0_1 = arith.constant 0 : index
    %3 = vector.load %arg2[%c0, %c0_1] : memref<8x32xf32, #tpu.memory_space<vmem>>, vector<8x32xf32>
    %4 = arith.truncf %3 : vector<8x32xf32> to vector<8x32xbf16>
    %c0_2 = arith.constant 0 : index
    %c0_3 = arith.constant 0 : index
    %5 = vector.load %arg3[%c0_2, %c0_3] : memref<32x128xbf16, #tpu.memory_space<vmem>>, vector<32x128xbf16>
    %cst = arith.constant dense<0.000000e+00> : vector<8x128xf32>
    %6 = tpu.matmul %4, %5, %cst {dimension_numbers = #tpu.dot_dimension_numbers<[1], [0], [0], [1], [0, 0, 1, 1], [], []>} : vector<8x32xbf16>, vector<32x128xbf16>, vector<8x128xf32> -> vector<8x128xf32>
    %c0_4 = arith.constant 0 : index
    %c0_5 = arith.constant 0 : index
    %7 = vector.load %arg4[%c0_4, %c0_5] : memref<1x128xf32, #tpu.memory_space<vmem>>, vector<1x128xf32>
    %8 = vector.broadcast %7 : vector<1x128xf32> to vector<8x128xf32>
    %9 = arith.addf %6, %8 : vector<8x128xf32>
    %cst_6 = arith.constant 5.000000e-01 : f32
    %10 = vector.broadcast %cst_6 : f32 to vector<8x128xf32>
    %11 = arith.mulf %10, %9 : vector<8x128xf32>
    %cst_7 = arith.constant 0.707106769 : f32
    %12 = vector.broadcast %cst_7 : f32 to vector<8x128xf32>
    %13 = arith.mulf %9, %12 : vector<8x128xf32>
    %14 = math.absf %13 : vector<8x128xf32>
    %cst_8 = arith.constant 0.327591091 : f32
    %15 = vector.broadcast %cst_8 : f32 to vector<8x128xf32>
    %16 = arith.mulf %15, %14 : vector<8x128xf32>
    %cst_9 = arith.constant 1.000000e+00 : f32
    %17 = vector.broadcast %cst_9 : f32 to vector<8x128xf32>
    %18 = arith.addf %17, %16 : vector<8x128xf32>
    %19 = tpu.reciprocal %18 {approx = true} : vector<8x128xf32> -> vector<8x128xf32>
    %cst_10 = arith.constant 1.06140542 : f32
    %20 = vector.broadcast %cst_10 : f32 to vector<8x128xf32>
    %21 = arith.mulf %20, %19 : vector<8x128xf32>
    %cst_11 = arith.constant -1.45315206 : f32
    %22 = vector.broadcast %cst_11 : f32 to vector<8x128xf32>
    %23 = arith.addf %21, %22 : vector<8x128xf32>
    %24 = arith.mulf %23, %19 : vector<8x128xf32>
    %cst_12 = arith.constant 1.42141378 : f32
    %25 = vector.broadcast %cst_12 : f32 to vector<8x128xf32>
    %26 = arith.addf %24, %25 : vector<8x128xf32>
    %27 = arith.mulf %26, %19 : vector<8x128xf32>
    %cst_13 = arith.constant -0.284496725 : f32
    %28 = vector.broadcast %cst_13 : f32 to vector<8x128xf32>
    %29 = arith.addf %27, %28 : vector<8x128xf32>
    %30 = arith.mulf %29, %19 : vector<8x128xf32>
    %cst_14 = arith.constant 0.254829586 : f32
    %31 = vector.broadcast %cst_14 : f32 to vector<8x128xf32>
    %32 = arith.addf %30, %31 : vector<8x128xf32>
    %33 = arith.mulf %32, %19 : vector<8x128xf32>
    %cst_15 = arith.constant 0.000000e+00 : f32
    %34 = vector.broadcast %cst_15 : f32 to vector<8x128xf32>
    %35 = arith.subf %34, %14 : vector<8x128xf32>
    %36 = arith.mulf %35, %14 : vector<8x128xf32>
    %37 = math.exp %36 : vector<8x128xf32>
    %38 = arith.mulf %33, %37 : vector<8x128xf32>
    %cst_16 = arith.constant 1.000000e+00 : f32
    %39 = vector.broadcast %cst_16 : f32 to vector<8x128xf32>
    %40 = arith.subf %39, %38 : vector<8x128xf32>
    %cst_17 = arith.constant 0.000000e+00 : f32
    %41 = vector.broadcast %cst_17 : f32 to vector<8x128xf32>
    %42 = arith.cmpf oge, %13, %41 : vector<8x128xf32>
    %cst_18 = arith.constant 0.000000e+00 : f32
    %43 = vector.broadcast %cst_18 : f32 to vector<8x128xf32>
    %44 = arith.subf %43, %40 : vector<8x128xf32>
    %45 = arith.select %42, %40, %44 : vector<8x128xi1>, vector<8x128xf32>
    %cst_19 = arith.constant 1.000000e+00 : f32
    %46 = vector.broadcast %cst_19 : f32 to vector<8x128xf32>
    %47 = arith.addf %46, %45 : vector<8x128xf32>
    %48 = arith.mulf %11, %47 : vector<8x128xf32>
    %c0_20 = arith.constant 0 : index
    %c0_21 = arith.constant 0 : index
    %49 = vector.load %arg8[%c0_20, %c0_21] : memref<8x128xf32, #tpu.memory_space<vmem>>, vector<8x128xf32>
    %50 = arith.truncf %48 : vector<8x128xf32> to vector<8x128xbf16>
    %c0_22 = arith.constant 0 : index
    %c0_23 = arith.constant 0 : index
    %51 = vector.load %arg5[%c0_22, %c0_23] : memref<128x128xbf16, #tpu.memory_space<vmem>>, vector<128x128xbf16>
    %cst_24 = arith.constant dense<0.000000e+00> : vector<8x128xf32>
    %52 = tpu.matmul %50, %51, %cst_24 {dimension_numbers = #tpu.dot_dimension_numbers<[1], [0], [0], [1], [0, 0, 1, 1], [], []>} : vector<8x128xbf16>, vector<128x128xbf16>, vector<8x128xf32> -> vector<8x128xf32>
    %53 = arith.addf %49, %52 : vector<8x128xf32>
    %c0_25 = arith.constant 0 : index
    %c0_26 = arith.constant 0 : index
    %54 = vector.load %arg8[%c0_25, %c0_26] : memref<8x128xf32, #tpu.memory_space<vmem>>, vector<8x128xf32>
    tpu.vector_store %arg8[%c0_25, %c0_26], %53 {strides = array<i32>} : memref<8x128xf32, #tpu.memory_space<vmem>>, vector<8x128xf32>,
    %c0_i32_27 = arith.constant 0 : i32
    %55 = arith.cmpi eq, %arg1, %c0_i32_27 : i32
    %56 = arith.extui %55 : i1 to i32
    %c0_i32_28 = arith.constant 0 : i32
    %57 = arith.cmpi ne, %56, %c0_i32_28 : i32
    scf.if %57 {
      %c0_29 = arith.constant 0 : index
      %c0_30 = arith.constant 0 : index
      %58 = vector.load %arg8[%c0_29, %c0_30] : memref<8x128xf32, #tpu.memory_space<vmem>>, vector<8x128xf32>
      %c0_31 = arith.constant 0 : index
      %c0_32 = arith.constant 0 : index
      %59 = vector.load %arg6[%c0_31, %c0_32] : memref<1x128xf32, #tpu.memory_space<vmem>>, vector<1x128xf32>
      %60 = vector.broadcast %59 : vector<1x128xf32> to vector<8x128xf32>
      %61 = arith.addf %58, %60 : vector<8x128xf32>
      %c0_33 = arith.constant 0 : index
      %c0_34 = arith.constant 0 : index
      %62 = vector.load %arg7[%c0_33, %c0_34] : memref<8x128xf32, #tpu.memory_space<vmem>>, vector<8x128xf32>
      tpu.vector_store %arg7[%c0_33, %c0_34], %61 {strides = array<i32>} : memref<8x128xf32, #tpu.memory_space<vmem>>, vector<8x128xf32>,
    } else {
    }
    return
  }
  func.func @transform_0(%arg0: i32, %arg1: i32) -> (i32, i32) {
    %c0_i32 = arith.constant 0 : i32
    %c0_i32_0 = arith.constant 0 : i32
    return %arg0, %c0_i32 : i32, i32
  }
  func.func @transform_1(%arg0: i32, %arg1: i32) -> (i32, i32) {
    %c0_i32 = arith.constant 0 : i32
    %c0_i32_0 = arith.constant 0 : i32
    return %c0_i32, %arg1 : i32, i32
  }
  func.func @transform_2(%arg0: i32, %arg1: i32) -> (i32, i32) {
    %c0_i32 = arith.constant 0 : i32
    %c0_i32_0 = arith.constant 0 : i32
    return %c0_i32, %arg1 : i32, i32
  }
  func.func @transform_3(%arg0: i32, %arg1: i32) -> (i32, i32) {
    %c0_i32 = arith.constant 0 : i32
    %c0_i32_0 = arith.constant 0 : i32
    return %arg1, %c0_i32 : i32, i32
  }
  func.func @transform_4(%arg0: i32, %arg1: i32) -> (i32, i32) {
    %c0_i32 = arith.constant 0 : i32
    %c0_i32_0 = arith.constant 0 : i32
    %c0_i32_1 = arith.constant 0 : i32
    return %c0_i32, %c0_i32_0 : i32, i32
  }
  func.func @transform_5(%arg0: i32, %arg1: i32) -> (i32, i32) {
    %c0_i32 = arith.constant 0 : i32
    %c0_i32_0 = arith.constant 0 : i32
    return %arg0, %c0_i32 : i32, i32
  }
}

module attributes {stable_mosaic.version = 11 : i64} {
  func.func @_ffn_kernel(%arg0: i32, %arg1: i32, %arg2: memref<8x32xf32, #tpu.memory_space<vmem>>, %arg3: memref<32x128xbf16, #tpu.memory_space<vmem>>, %arg4: memref<1x128xf32, #tpu.memory_space<vmem>>, %arg5: memref<128x128xbf16, #tpu.memory_space<vmem>>, %arg6: memref<1x128xf32, #tpu.memory_space<vmem>>, %arg7: memref<8x128xf32, #tpu.memory_space<vmem>>, %arg8: memref<8x128xf32, #tpu.memory_space<vmem>>) attributes {dimension_semantics = [#tpu.dimension_semantics<parallel>, #tpu.dimension_semantics<arbitrary>], iteration_bounds = array<i64: 2, 1>, scalar_prefetch = 0 : i64, scratch_operands = 1 : i64, tpu.core_type = #tpu.core_type<tc>, window_params = [{transform_indices = @transform_0, window_bounds = array<i64: 8, 32>}, {transform_indices = @transform_1, window_bounds = array<i64: 32, 128>}, {transform_indices = @transform_2, window_bounds = array<i64: 1, 128>}, {transform_indices = @transform_3, window_bounds = array<i64: 128, 128>}, {pipeline_mode = #tpu.pipeline_mode<synchronous>, transform_indices = @transform_4, window_bounds = array<i64: 1, 128>}, {transform_indices = @transform_5, window_bounds = array<i64: 8, 128>}]} {
    %c0_i32 = arith.constant 0 : i32
    %0 = arith.cmpi eq, %arg1, %c0_i32 : i32
    %1 = arith.extui %0 : i1 to i32
    %c0_i32_0 = arith.constant 0 : i32
    %2 = arith.cmpi ne, %1, %c0_i32_0 : i32
    scf.if %2 {
      %cst_29 = arith.constant 0.000000e+00 : f32
      %58 = vector.broadcast %cst_29 : f32 to vector<8x128xf32>
      %c0_30 = arith.constant 0 : index
      %c0_31 = arith.constant 0 : index
      %59 = vector.load %arg8[%c0_30, %c0_31] : memref<8x128xf32, #tpu.memory_space<vmem>>, vector<8x128xf32>
      tpu.vector_store %arg8[%c0_30, %c0_31], %58 {strides = array<i32>} : memref<8x128xf32, #tpu.memory_space<vmem>>, vector<8x128xf32>,
    } else {
    }
    %c0 = arith.constant 0 : index
    %c0_1 = arith.constant 0 : index
    %3 = vector.load %arg2[%c0, %c0_1] : memref<8x32xf32, #tpu.memory_space<vmem>>, vector<8x32xf32>
    %4 = arith.truncf %3 : vector<8x32xf32> to vector<8x32xbf16>
    %c0_2 = arith.constant 0 : index
    %c0_3 = arith.constant 0 : index
    %5 = vector.load %arg3[%c0_2, %c0_3] : memref<32x128xbf16, #tpu.memory_space<vmem>>, vector<32x128xbf16>
    %cst = arith.constant dense<0.000000e+00> : vector<8x128xf32>
    %6 = tpu.matmul %4, %5, %cst {dimension_numbers = #tpu.dot_dimension_numbers<[1], [0], [0], [1], [0, 0, 1, 1], [], []>} : vector<8x32xbf16>, vector<32x128xbf16>, vector<8x128xf32> -> vector<8x128xf32>
    %c0_4 = arith.constant 0 : index
    %c0_5 = arith.constant 0 : index
    %7 = vector.load %arg4[%c0_4, %c0_5] : memref<1x128xf32, #tpu.memory_space<vmem>>, vector<1x128xf32>
    %8 = vector.broadcast %7 : vector<1x128xf32> to vector<8x128xf32>
    %9 = arith.addf %6, %8 : vector<8x128xf32>
    %cst_6 = arith.constant 5.000000e-01 : f32
    %10 = vector.broadcast %cst_6 : f32 to vector<8x128xf32>
    %11 = arith.mulf %10, %9 : vector<8x128xf32>
    %cst_7 = arith.constant 0.707106769 : f32
    %12 = vector.broadcast %cst_7 : f32 to vector<8x128xf32>
    %13 = arith.mulf %9, %12 : vector<8x128xf32>
    %14 = math.absf %13 : vector<8x128xf32>
    %cst_8 = arith.constant 0.327591091 : f32
    %15 = vector.broadcast %cst_8 : f32 to vector<8x128xf32>
    %16 = arith.mulf %15, %14 : vector<8x128xf32>
    %cst_9 = arith.constant 1.000000e+00 : f32
    %17 = vector.broadcast %cst_9 : f32 to vector<8x128xf32>
    %18 = arith.addf %17, %16 : vector<8x128xf32>
    %19 = tpu.reciprocal %18 {approx = true} : vector<8x128xf32> -> vector<8x128xf32>
    %cst_10 = arith.constant 1.06140542 : f32
    %20 = vector.broadcast %cst_10 : f32 to vector<8x128xf32>
    %21 = arith.mulf %20, %19 : vector<8x128xf32>
    %cst_11 = arith.constant -1.45315206 : f32
    %22 = vector.broadcast %cst_11 : f32 to vector<8x128xf32>
    %23 = arith.addf %21, %22 : vector<8x128xf32>
    %24 = arith.mulf %23, %19 : vector<8x128xf32>
    %cst_12 = arith.constant 1.42141378 : f32
    %25 = vector.broadcast %cst_12 : f32 to vector<8x128xf32>
    %26 = arith.addf %24, %25 : vector<8x128xf32>
    %27 = arith.mulf %26, %19 : vector<8x128xf32>
    %cst_13 = arith.constant -0.284496725 : f32
    %28 = vector.broadcast %cst_13 : f32 to vector<8x128xf32>
    %29 = arith.addf %27, %28 : vector<8x128xf32>
    %30 = arith.mulf %29, %19 : vector<8x128xf32>
    %cst_14 = arith.constant 0.254829586 : f32
    %31 = vector.broadcast %cst_14 : f32 to vector<8x128xf32>
    %32 = arith.addf %30, %31 : vector<8x128xf32>
    %33 = arith.mulf %32, %19 : vector<8x128xf32>
    %cst_15 = arith.constant 0.000000e+00 : f32
    %34 = vector.broadcast %cst_15 : f32 to vector<8x128xf32>
    %35 = arith.subf %34, %14 : vector<8x128xf32>
    %36 = arith.mulf %35, %14 : vector<8x128xf32>
    %37 = math.exp %36 : vector<8x128xf32>
    %38 = arith.mulf %33, %37 : vector<8x128xf32>
    %cst_16 = arith.constant 1.000000e+00 : f32
    %39 = vector.broadcast %cst_16 : f32 to vector<8x128xf32>
    %40 = arith.subf %39, %38 : vector<8x128xf32>
    %cst_17 = arith.constant 0.000000e+00 : f32
    %41 = vector.broadcast %cst_17 : f32 to vector<8x128xf32>
    %42 = arith.cmpf oge, %13, %41 : vector<8x128xf32>
    %cst_18 = arith.constant 0.000000e+00 : f32
    %43 = vector.broadcast %cst_18 : f32 to vector<8x128xf32>
    %44 = arith.subf %43, %40 : vector<8x128xf32>
    %45 = arith.select %42, %40, %44 : vector<8x128xi1>, vector<8x128xf32>
    %cst_19 = arith.constant 1.000000e+00 : f32
    %46 = vector.broadcast %cst_19 : f32 to vector<8x128xf32>
    %47 = arith.addf %46, %45 : vector<8x128xf32>
    %48 = arith.mulf %11, %47 : vector<8x128xf32>
    %c0_20 = arith.constant 0 : index
    %c0_21 = arith.constant 0 : index
    %49 = vector.load %arg8[%c0_20, %c0_21] : memref<8x128xf32, #tpu.memory_space<vmem>>, vector<8x128xf32>
    %50 = arith.truncf %48 : vector<8x128xf32> to vector<8x128xbf16>
    %c0_22 = arith.constant 0 : index
    %c0_23 = arith.constant 0 : index
    %51 = vector.load %arg5[%c0_22, %c0_23] : memref<128x128xbf16, #tpu.memory_space<vmem>>, vector<128x128xbf16>
    %cst_24 = arith.constant dense<0.000000e+00> : vector<8x128xf32>
    %52 = tpu.matmul %50, %51, %cst_24 {dimension_numbers = #tpu.dot_dimension_numbers<[1], [0], [0], [1], [0, 0, 1, 1], [], []>} : vector<8x128xbf16>, vector<128x128xbf16>, vector<8x128xf32> -> vector<8x128xf32>
    %53 = arith.addf %49, %52 : vector<8x128xf32>
    %c0_25 = arith.constant 0 : index
    %c0_26 = arith.constant 0 : index
    %54 = vector.load %arg8[%c0_25, %c0_26] : memref<8x128xf32, #tpu.memory_space<vmem>>, vector<8x128xf32>
    tpu.vector_store %arg8[%c0_25, %c0_26], %53 {strides = array<i32>} : memref<8x128xf32, #tpu.memory_space<vmem>>, vector<8x128xf32>,
    %c0_i32_27 = arith.constant 0 : i32
    %55 = arith.cmpi eq, %arg1, %c0_i32_27 : i32
    %56 = arith.extui %55 : i1 to i32
    %c0_i32_28 = arith.constant 0 : i32
    %57 = arith.cmpi ne, %56, %c0_i32_28 : i32
    scf.if %57 {
      %c0_29 = arith.constant 0 : index
      %c0_30 = arith.constant 0 : index
      %58 = vector.load %arg8[%c0_29, %c0_30] : memref<8x128xf32, #tpu.memory_space<vmem>>, vector<8x128xf32>
      %c0_31 = arith.constant 0 : index
      %c0_32 = arith.constant 0 : index
      %59 = vector.load %arg6[%c0_31, %c0_32] : memref<1x128xf32, #tpu.memory_space<vmem>>, vector<1x128xf32>
      %60 = vector.broadcast %59 : vector<1x128xf32> to vector<8x128xf32>
      %61 = arith.addf %58, %60 : vector<8x128xf32>
      %c0_33 = arith.constant 0 : index
      %c0_34 = arith.constant 0 : index
      %62 = vector.load %arg7[%c0_33, %c0_34] : memref<8x128xf32, #tpu.memory_space<vmem>>, vector<8x128xf32>
      tpu.vector_store %arg7[%c0_33, %c0_34], %61 {strides = array<i32>} : memref<8x128xf32, #tpu.memory_space<vmem>>, vector<8x128xf32>,
    } else {
    }
    return
  }
  func.func @transform_0(%arg0: i32, %arg1: i32) -> (i32, i32) {
    %c0_i32 = arith.constant 0 : i32
    %c0_i32_0 = arith.constant 0 : i32
    return %arg0, %c0_i32 : i32, i32
  }
  func.func @transform_1(%arg0: i32, %arg1: i32) -> (i32, i32) {
    %c0_i32 = arith.constant 0 : i32
    %c0_i32_0 = arith.constant 0 : i32
    return %c0_i32, %arg1 : i32, i32
  }
  func.func @transform_2(%arg0: i32, %arg1: i32) -> (i32, i32) {
    %c0_i32 = arith.constant 0 : i32
    %c0_i32_0 = arith.constant 0 : i32
    return %c0_i32, %arg1 : i32, i32
  }
  func.func @transform_3(%arg0: i32, %arg1: i32) -> (i32, i32) {
    %c0_i32 = arith.constant 0 : i32
    %c0_i32_0 = arith.constant 0 : i32
    return %arg1, %c0_i32 : i32, i32
  }
  func.func @transform_4(%arg0: i32, %arg1: i32) -> (i32, i32) {
    %c0_i32 = arith.constant 0 : i32
    %c0_i32_0 = arith.constant 0 : i32
    %c0_i32_1 = arith.constant 0 : i32
    return %c0_i32, %c0_i32_0 : i32, i32
  }
  func.func @transform_5(%arg0: i32, %arg1: i32) -> (i32, i32) {
    %c0_i32 = arith.constant 0 : i32
    %c0_i32_0 = arith.constant 0 : i32
    return %arg0, %c0_i32 : i32, i32
  }
}

</mosaic_0001>

<bundles_post_ra>
// kernel: tpu_custom_call.1
= control target key start
LH: loop header
LB: loop body
LE: loop exit
PB: predicated region body
PF: predicated region fallthrough
CT: control target
= control target key end

     0   :  { %10 = vsyncpa [#allocation4], 0  ;;  %s1304_s0 = inlined_call_operand.hbm [shape: f32[16,32], index: 0, kind: input, shape index: {}]   ;;  %s1305_s1 = inlined_call_operand.hbm [shape: bf16[32,128], index: 1, kind: input, shape index: {}]   ;;  %s1306_s2 = inlined_call_operand.vmem [shape: f32[1,128], index: 2, kind: input, shape index: {}]   ;;  %s1307_s3 = inlined_call_operand.hbm [shape: bf16[128,128], index: 3, kind: input, shape index: {}]   ;;  %s1308_s4 = inlined_call_operand.vmem [shape: f32[1,128], index: 4, kind: input, shape index: {}]   ;;  %s1309_s5 = inlined_call_operand.hbm [shape: f32[16,128], index: 5, kind: output, shape index: {}]  }
   0x1   :  { %12 = vsyncpa [#allocation4 + $0x1], 0 }
   0x2   :  { %13 = vsyncpa [#allocation7], 0 }
   0x3   :  { %14 = vsyncpa [#allocation5], 0 }
   0x4   :  { %16 = vsyncpa [#allocation5 + $0x1], 0  ;;  %s1044_s18 = smov 0   ;;  %s1046_s19 = smov 0  }
   0x5   :  { %s1048_s20 = smov 0   ;;  %s1050_s21 = smov 0  }
   0x6   :  { %s1052_s22 = smov 0   ;;  %s1054_s23 = smov 0  }
   0x7 LB: > { %s660_s24 = sadd.s32 4294967295, %s1004_s23   ;;  %s661_s25 = sadd.s32 4294967294, %s1004_s23   ;;  %s1004_s23 = sphi %s1054_s23, %s22_s23   ;;  %s1000_s22 = sphi %s1052_s22, %s1331_s22   ;;  %s996_s21 = sphi %s1050_s21, %s1330_s21   ;;  %s992_s20 = sphi %s1048_s20, %s1329_s20   ;;  %s988_s19 = sphi %s1046_s19, %s1328_s19   ;;  %s984_s18 = sphi %s1044_s18, %s1327_s18  }
   0x8   : > { %p54_p0 = scmp.ne.s32.totalorder %s988_s19, %s984_s18  ;;  %p1078_p1 = scmp.eq.s32.totalorder %s660_s24, 0 }
   0x9   : > { %p1082_p2 = scmp.eq.s32.totalorder %s660_s24, 1  ;;  %p183_p3 = scmp.eq.s32.totalorder %s661_s25, 1 }
   0xa   : > { %s1314_s26 = scalar_select %p1078_p1, 1, 0 }
   0xb   : > { %p1088_p4 = por %p1078_p1, %p54_p0  ;;  %p662_p5 = scmp.ge.s32.totalorder %s1004_s23, 1 }
   0xc   : > { %p1093_p6 = por %p183_p3, %p54_p0  ;;  %p190_p7 = scmp.lt.s32.totalorder %s1004_s23, 3 }
   0xd   : > { %s1316_s28 = scalar_select %p1088_p4, 1, 0 }
   0xe   : > { %s1317_s29 = scalar_select %p1093_p6, 1, 0 }
   0xf   : > { %p1098_p8 = pnand %p662_p5, %p190_p7  ;;  %s1006_s6 = smov [#allocation6]  }
  0x10   : > { %s204_s7 = sshll.u32 %s1006_s6, 4  ;;  %s1007_s9 = smov [#allocation8]   ;;  %s1102_s7 = int_to_ptr.vmem [resolvable:$true] %s204_s7 }
  0x11   : > { %p743_p9 = pneg %p1098_p8  ;;  %s226_s10 = sshll.u32 %s1007_s9, 4  ;;  %s1113_s10 = int_to_ptr.vmem [resolvable:$true] %s226_s10 }
  0x12   : > { %s832_s13 = scalar_lea.hbm %s1305_s1, 256 }
  0x13   : > { %p1109_p11 = pnand %p743_p9, %p1078_p1  ;;  %p833_p12 = scmp.ne.s32.totalorder %s1305_s1, %s832_s13 }
  0x14   : > { %p839_p5 = scmp.lt.u32.totalorder %s832_s13, %s1305_s1 }
  0x15   : > { %p834_p13 = pneg %p1109_p11 }
  0x17   : > { %p835_p0 = pnand %p834_p13, %p833_p12 }
  0x19   : > { %p836_p3 = pneg %p835_p0 }
  0x1b   : > { %p841_p7 = pnand %p839_p5, %p836_p3 }
  0x1d   : > { %844 = shalt.err (!%p841_p7)
}
  0x1e   : > { %s845_s24 = scalar_lea.vmem %s1102_s7, 256  ;;  %p853_p1 = scmp.lt.s32.totalorder %s1102_s7, %s1102_s7 }
  0x1f   : > { %p846_p9 = scmp.ne.s32.totalorder %s1102_s7, %s845_s24  ;;  %p854_p12 = scmp.lt.s32.totalorder %s845_s24, %s845_s24 }
  0x21   : > { %p848_p10 = pnand %p846_p9, %p834_p13  ;;  %p855_p0 = por %p854_p12, %p853_p1 }
  0x23   : > { %p849_p6 = pneg %p848_p10 }
  0x25   : > { %p856_p4 = pnand %p855_p0, %p849_p6 }
  0x27   : > { %859 = shalt.err (!%p856_p4)
}
  0x28   : > { %s1008_s25 = smov 64   ;;  %s1009_s6 = smov 4  }
  0x29   : > { %746 = dma.hbm_to_vmem [thread:$0]  (!%p1109_p11), %s1305_s1, 256, %s1102_s7, [#allocation7], %s1008_s25, %s1008_s25, %s1009_s6  }
  0x2a   : > { %s860_s14 = scalar_lea.hbm %s1307_s3, 1024 }
  0x2b   : > { %p861_p1 = scmp.ne.s32.totalorder %s1307_s3, %s860_s14  ;;  %p867_p10 = scmp.lt.u32.totalorder %s860_s14, %s1307_s3 }
  0x2d   : > { %p863_p4 = pnand %p861_p1, %p834_p13 }
  0x2f   : > { %p864_p6 = pneg %p863_p4 }
  0x31   : > { %p869_p3 = pnand %p867_p10, %p864_p6 }
  0x33   : > { %872 = shalt.err (!%p869_p3)
}
  0x34   : > { %s873_s7 = scalar_lea.vmem %s1113_s10, 1024  ;;  %p881_p12 = scmp.lt.s32.totalorder %s1113_s10, %s1113_s10 }
  0x35   : > { %p874_p5 = scmp.ne.s32.totalorder %s1113_s10, %s873_s7  ;;  %p882_p0 = scmp.lt.s32.totalorder %s873_s7, %s873_s7 }
  0x37   : > { %p876_p7 = pnand %p874_p5, %p834_p13  ;;  %p883_p1 = por %p882_p0, %p881_p12 }
  0x39   : > { %p877_p9 = pneg %p876_p7 }
  0x3b   : > { %p884_p4 = pnand %p883_p1, %p877_p9 }
  0x3d   : > { %887 = shalt.err (!%p884_p4)
}
  0x3e   : > { %749 = dma.hbm_to_vmem [thread:$0]  (!%p1109_p11), %s1307_s3, 1024, %s1113_s10, [#allocation7], %s1008_s25, %s1008_s25, %s1009_s6  }
  0x3f   : > { %s34_s12 = sadd.s32 1, %s1000_s22  ;;  %s41_s13 = sadd.s32 1, %s992_s20 }
  0x40   : > { %p36_p13 = scmp.ge.s32.totalorder %s34_s12, 2  ;;  %p48_p6 = scmp.ne.s32.totalorder %s992_s20, %s988_s19 }
  0x41   : > { %p49_p10 = scmp.eq.s32.totalorder %s1004_s23, 0  ;;  %p760_p3 = scmp.lt.s32.totalorder %s1004_s23, 2 }
  0x42   : > { %s1333_s12 = smov (%p36_p13, %s34_s12), 0  ;;  %p1177_p7 = por %p1082_p2, %p48_p6 }
  0x43   : > { %p50_p5 = por %p49_p10, %p48_p6  ;;  %s38_s14 = ssub.s32 %s1000_s22, %s1333_s12 }
  0x44   : > { %s1320_s8 = scalar_select %p1177_p7, 1, 0 }
  0x45   : > { %s243_s15 = sand.u32 1, %s992_s20   ;;  %p39_p9 = scmp.eq.s32.totalorder %s38_s14, 0 }
  0x46   : > { %s667_s10 = sshll.u32 %s243_s15, 3  ;;  %s668_s25 = sshll.u32 %s1000_s22, 7 }
  0x47   : > { %s1186_s6 = scalar_select %p39_p9, %s992_s20, %s41_s13  }
  0x48   : > { %s1191_s24 = scalar_lea.hbm %s1304_s0, %s668_s25  ;;  %s247_s27 = scalar_lea.vmem [#allocation3], %s667_s10 }
  0x49   : > { %s254_s7 = sshll.u32 %s247_s27, 4  ;;  %p1195_p2 = pnand %p760_p3, %p50_p5  ;;  %s1199_s7 = int_to_ptr.vmem [resolvable:$true] %s254_s7 }
  0x4a   : > { %s244_s11 = scalar_lea.sflag [#allocation4], %s243_s15  ;;  %s888_s13 = scalar_lea.hbm %s1191_s24, 128 }
  0x4b   : > { %p889_p11 = scmp.ne.s32.totalorder %s1191_s24, %s888_s13  ;;  %p890_p12 = pneg %p1195_p2 }
  0x4c   : > { %s893_s25 = scalar_lea.hbm %s1304_s0, 256  ;;  %p894_p4 = scmp.lt.u32.totalorder %s1191_s24, %s1304_s0 }
  0x4d   : > { %p891_p0 = pnand %p890_p12, %p889_p11  ;;  %p895_p13 = scmp.lt.u32.totalorder %s893_s25, %s888_s13 }
  0x4e   : > { %p897_p10 = scmp.lt.u32.totalorder %s888_s13, %s1191_s24 }
  0x4f   : > { %p892_p1 = pneg %p891_p0  ;;  %p896_p6 = por %p895_p13, %p894_p4 }
  0x51   : > { %p898_p3 = por %p897_p10, %p896_p6 }
  0x53   : > { %p899_p5 = pnand %p898_p3, %p892_p1 }
  0x55   : > { %902 = shalt.err (!%p899_p5)
}
  0x56   : > { %s903_s15 = scalar_lea.vmem %s1199_s7, 128  ;;  %s1010_s27 = smov [#allocation3]  }
  0x57   : > { %p904_p9 = scmp.ne.s32.totalorder %s1199_s7, %s903_s15  ;;  %s908_s14 = sshll.u32 %s1010_s27, 4  ;;  %s909_s14 = int_to_ptr.vmem [resolvable:$false] %s908_s14 }
  0x58   : > { %s910_s10 = scalar_lea.vmem %s909_s14, 256  ;;  %p911_p7 = scmp.lt.s32.totalorder %s1199_s7, %s909_s14 }
  0x59   : > { %p906_p11 = pnand %p904_p9, %p890_p12  ;;  %p912_p4 = scmp.lt.s32.totalorder %s910_s10, %s903_s15 }
  0x5b   : > { %p907_p0 = pneg %p906_p11  ;;  %p913_p13 = por %p912_p4, %p911_p7 }
  0x5d   : > { %p914_p6 = pnand %p913_p13, %p907_p0 }
  0x5f   : > { %917 = shalt.err (!%p914_p6)
}
  0x60   : > { %753 = dma.hbm_to_vmem [thread:$0]  (!%p1195_p2), %s1191_s24, 128, %s1199_s7, %s244_s11  }
  0x61   : > { %263 = sbr.rel (%p1098_p8) target bundleno = 610 (0x262), region = 40  ;;  %s1229_s13 = sand.u32 (!%p1098_p8), 1, %s988_s19  }
  0x62   : > { %s670_s25 = sshll.u32 (!%p1098_p8), %s1229_s13, 3  ;;  %s266_s16 = scalar_lea.sflag (!%p1098_p8), [#allocation4], %s1229_s13 }
  0x63   : > { %s269_s17 = scalar_lea.vmem (!%p1098_p8), [#allocation3], %s670_s25  ;;  %p1322_p7 = scmp.ne.s32.totalorder (!%p1098_p8), %s1316_s28, 0 }
  0x68   : > { %971 = dma.done.wait (%p1322_p7), %s266_s16, 128  }
  0x69   : > { %973 = vsyncadd (%p1322_p7), %s266_s16, 4294967168  ;;  %p1323_p2 = scmp.ne.s32.totalorder %s1314_s26, 0 }
  0x6b   : > { %975 = dma.done.wait (%p1323_p2), [#allocation7], 1280  }
  0x6c   : > { %977 = vsyncadd (%p1323_p2), [#allocation7], 4294966016  ;;  %v1011_v0 = vmov 0.0   ;;  %vm1012_vm0 = vmmov 0   ;;  %v818_v1 = vld [vmem:[#allocation6] sm:$0xff]   ;;  %v819_v2 = vld [vmem:[#allocation6 + $0x8] sm:$0xff]  }
  0x6d   : > { %703 = vmatprep.subr.bf16.mxu0 %v1011_v0  ;;  %707 = vmatprep.mubr.msk.bf16.mxu0 %vm1012_vm0, %v1011_v0  ;;  %v317_v3 = vld [vmem:[%s269_s17] sm:$0xff]  ;;  %vm342_vm1 = vcmask 261120   ;;  %v822_v7 = vld [vmem:[#allocation8 + $0x10] sm:$0xff]   ;;  %v823_v8 = vld [vmem:[#allocation8 + $0x18] sm:$0xff]   ;;  %s688_s7 = sshll.u32 %s996_s21, 7  ;;  %s306_s9 = scalar_lea.vmem [#allocation9], %s670_s25 }
  0x6e   : > { %711 = vmatprep.subr.bf16.mxu1 %v1011_v0  ;;  %727 = vmatprep.mubr.msk.bf16.mxu1 %vm1012_vm0, %v1011_v0  ;;  %v318_v4 = vpack.c.bf16 %v317_v3, %v317_v3  ;;  %v820_v5 = vld [vmem:[#allocation8] sm:$0xff]   ;;  %v821_v6 = vld [vmem:[#allocation8 + $0x8] sm:$0xff]   ;;  %v826_v11 = vld [vmem:[#allocation8 + $0x30] sm:$0xff]   ;;  %s547_s11 = sshll.u32 %s306_s9, 4  ;;  %s1255_s14 = scalar_lea.hbm %s1309_s5, %s688_s7  ;;  %s1257_s11 = int_to_ptr.vmem [resolvable:$true] %s547_s11 }
  0x6f   : > { %704 = vmatpush3.bf16.msra.mxu0 %v818_v1  ;;  %712 = vmatpush3.bf16.msra.mxu1 %v820_v5  ;;  %v824_v9 = vld [vmem:[#allocation8 + $0x20] sm:$0xff]   ;;  %v825_v10 = vld [vmem:[#allocation8 + $0x28] sm:$0xff]   ;;  %v827_v12 = vld [vmem:[#allocation8 + $0x38] sm:$0xff]   ;;  %s534_s21 = scalar_lea.sflag [#allocation5], %s1229_s13  ;;  %s918_s10 = scalar_lea.vmem %s1257_s11, 128 }
  0x70   : > { %705 = vmatprep.subr.bf16.mxu0 %v1011_v0  ;;  %713 = vmatprep.subr.bf16.mxu1 %v1011_v0  ;;  %v674_v13 = vld [vmem:[%s1306_s2] ss:$0 sm:$0xff]  ;;  %p919_p8 = scmp.ne.s32.totalorder %s1257_s11, %s918_s10  ;;  %p1324_p12 = scmp.ne.s32.totalorder %s1320_s8, 0 }
  0x71   : > { %v686_v45 = vld [vmem:[%s1308_s4] ss:$0 sm:$0xff]  ;;  %s1013_s25 = smov [#allocation9]  }
  0x72   : > { %p920_p1 = pnand %p919_p8, %p1324_p12  ;;  %s922_s16 = sshll.u32 %s1013_s25, 4  ;;  %s923_s16 = int_to_ptr.vmem [resolvable:$false] %s922_s16 }
  0x73   : > { %706 = vmatpush3.bf16.msra.mxu0 %v819_v2  ;;  %714 = vmatpush3.bf16.msra.mxu1 %v821_v6  ;;  %s924_s17 = scalar_lea.vmem %s923_s16, 256  ;;  %p925_p3 = scmp.lt.s32.totalorder %s1257_s11, %s923_s16 }
  0x74   : > { %715 = vmatprep.subr.bf16.mxu1 %v1011_v0  ;;  %p921_p10 = pneg %p920_p1  ;;  %p926_p5 = scmp.lt.s32.totalorder %s924_s17, %s918_s10 }
  0x76   : > { %708 = vmatmul.mubr.msk.bf16.vlgmr.msra.gmra.mrb[0].mxu0 %vm342_vm1, %v318_v4  ;;  %p927_p9 = por %p926_p5, %p925_p3 }
  0x77   : > { %716 = vmatpush3.bf16.msra.mxu1 %v822_v7 }
  0x78   : > { %717 = vmatprep.subr.bf16.mxu1 %v1011_v0  ;;  %p928_p11 = pnand %p927_p9, %p921_p10 }
  0x7b   : > { %718 = vmatpush3.bf16.msra.mxu1 %v823_v8 }
  0x7c   : > { %719 = vmatprep.subr.bf16.mxu1 %v1011_v0 }
  0x7f   : > { %720 = vmatpush3.bf16.msra.mxu1 %v824_v9 }
  0x80   : > { %721 = vmatprep.subr.bf16.mxu1 %v1011_v0 }
  0x83   : > { %722 = vmatpush3.bf16.msra.mxu1 %v825_v10 }
  0x84   : > { %723 = vmatprep.subr.bf16.mxu1 %v1011_v0 }
  0x87   : > { %724 = vmatpush3.bf16.msra.mxu1 %v826_v11 }
  0x88   : > { %725 = vmatprep.subr.bf16.mxu1 %v1011_v0 }
  0x8b   : > { %726 = vmatpush3.bf16.msra.mxu1 %v827_v12 }
 0x149   : > { %v380_v14 = vpop.f32.mrb[0].mxu0 }
 0x14a   : > { %v381_v15 = vadd.f32 %v674_v13, %v380_v14  ;;  %v709_v16 = vpop.f32.mrb[1].mxu0 }
 0x14b   : > { %v383_v17 = vpop.f32.mrb[2].mxu0 }
 0x14c   : > { %v387_v18 = vmul.f32 0.70710677, %v381_v15  ;;  %v710_v19 = vpop.f32.mrb[3].mxu0  ;;  %v386_v41 = vmul.f32 0.5, %v381_v15 }
 0x14e   : > { %v388_v20 = vand.u32 2147483647, %v387_v18  ;;  %vm407_vm2 = vcmp.ge.f32.partialorder %v387_v18, 0.0 }
 0x150   : > { %v389_v21 = vmul.f32 0.3275911, %v388_v20  ;;  %v401_v23 = vsub.f32 0.0, %v388_v20 }
 0x152   : > { %v390_v22 = vadd.f32 1.0, %v389_v21  ;;  %v402_v25 = vmul.f32 %v401_v23, %v388_v20 }
 0x154   : > { %828 = vrcp.f32 %v390_v22  ;;  %v403_v28 = vmul.f32 1.442695, %v402_v25 }
 0x156   : > { %830 = vpow2.f32 %v403_v28 }
 0x15e   : > { %v829_v24 = vpop.eup %828 }
 0x15f   : > { %v392_v26 = vmul.f32 1.0614054, %v829_v24 }
 0x160   : > { %v831_v36 = vpop.eup %830 }
 0x161   : > { %v393_v27 = vadd.f32 -1.4531521, %v392_v26 }
 0x163   : > { %v394_v29 = vmul.f32 %v829_v24, %v393_v27 }
 0x165   : > { %v395_v30 = vadd.f32 1.4214138, %v394_v29 }
 0x167   : > { %v396_v31 = vmul.f32 %v829_v24, %v395_v30 }
 0x169   : > { %v397_v32 = vadd.f32 -0.28449672, %v396_v31 }
 0x16b   : > { %v398_v33 = vmul.f32 %v829_v24, %v397_v32 }
 0x16d   : > { %v399_v34 = vadd.f32 0.2548296, %v398_v33 }
 0x16f   : > { %v400_v35 = vmul.f32 %v829_v24, %v399_v34 }
 0x171   : > { %v405_v37 = vmul.f32 %v831_v36, %v400_v35 }
 0x173   : > { %v406_v38 = vsub.f32 1.0, %v405_v37 }
 0x175   : > { %v408_v39 = vsub.f32 0.0, %v406_v38 }
 0x177   : > { %v409_v40 = vsel %vm407_vm2, %v406_v38, %v408_v39 }
 0x178   : > { %v410_v42 = vadd.f32 1.0, %v409_v40 }
 0x17a   : > { %v411_v43 = vmul.f32 %v410_v42, %v386_v41 }
 0x17c   : > { %v413_v44 = vpack.c.bf16 %v411_v43, %v411_v43 }
 0x17e   : > { %728 = vmatmul.mubr.bf16.vlgmr.msra.gmra.mrb[0].mxu1 %v413_v44 }
 0x251   : > { %v512_v46 = vpop.f32.mrb[0].mxu1 }
 0x252   : > { %v531_v47 = vadd.f32 %v686_v45, %v512_v46  ;;  %v729_v48 = vpop.f32.mrb[1].mxu1 }
 0x253   : > { %v515_v49 = vpop.f32.mrb[2].mxu1 }
 0x254   : > { %532 = vst [vmem:[%s306_s9] sm:$0xff] %v531_v47  ;;  %v730_v50 = vpop.f32.mrb[3].mxu1 }
 0x255   : > { %931 = shalt.err (!%p928_p11)
}
 0x256   : > { %s932_s13 = scalar_lea.hbm %s1255_s14, 128  ;;  %s936_s30 = scalar_lea.hbm %s1309_s5, 256 }
 0x257   : > { %p933_p0 = scmp.ne.s32.totalorder %s1255_s14, %s932_s13  ;;  %p937_p6 = scmp.lt.u32.totalorder %s1255_s14, %s1309_s5 }
 0x258   : > { %p938_p7 = scmp.lt.u32.totalorder %s936_s30, %s932_s13  ;;  %p940_p8 = scmp.lt.u32.totalorder %s932_s13, %s1255_s14 }
 0x259   : > { %p934_p4 = pnand %p933_p0, %p1324_p12 }
 0x25a   : > { %p939_p2 = por %p938_p7, %p937_p6 }
 0x25b   : > { %p935_p13 = pneg %p934_p4 }
 0x25c   : > { %p941_p1 = por %p940_p8, %p939_p2 }
 0x25e   : > { %p942_p10 = pnand %p941_p1, %p935_p13 }
 0x260   : > { %945 = shalt.err (!%p942_p10)
}
 0x261   : > { %741 = dma.vmem_to_hbm [thread:$0]  (%p1324_p12), %s1257_s11, 128, %s1255_s14, %s534_s21  }
 0x262 PF: > { %s559_s9 = sand.u32 1, %s984_s18   ;;  %p1325_p3 = scmp.ne.s32.totalorder %s1317_s29, 0 }
 0x263   : > { %p1326_p5 = scmp.ge.s32.totalorder %s1004_s23, 2  ;;  %s560_s15 = scalar_lea.sflag [#allocation5], %s559_s9 }
 0x265   : > { %p755_p9 = pnand %p1326_p5, %p1325_p3 }
 0x267   : > { %979 = dma.done.wait (!%p755_p9), %s560_s15, 128  }
 0x268   : > { %981 = vsyncadd (!%p755_p9), %s560_s15, 4294967168  ;;  %s22_s23 = sadd.s32 1, %s1004_s23   ;;  %s1327_s18 = smov %s988_s19 }
 0x269   : > { %p19_p11 = scmp.ge.s32.totalorder %s22_s23, 4   ;;  %s1328_s19 = smov %s992_s20 }
 0x26a   : > { %s1329_s20 = smov %s1186_s6  ;;  %s1330_s21 = smov %s1000_s22 }
 0x26b   : > { %s1331_s22 = smov %s1333_s12  ;;  %21 = sbr.rel (!%p19_p11) target bundleno = 7 (0x7), region = 106 }
 0x272   :  { %565 = vsyncpa [#allocation4], 1 }
 0x273   :  { %567 = vsyncpa [#allocation4 + $0x1], 1 }
 0x274   :  { %568 = vsyncpa [#allocation7], 1 }
 0x275   :  { %569 = vsyncpa [#allocation5], 1 }
 0x276   :  { %571 = vsyncpa [#allocation5 + $0x1], 1 }

// kernel: tpu_custom_call.1
= control target key start
LH: loop header
LB: loop body
LE: loop exit
PB: predicated region body
PF: predicated region fallthrough
CT: control target
= control target key end

     0   :  { %10 = vsyncpa [#allocation4], 0  ;;  %s1304_s0 = inlined_call_operand.hbm [shape: f32[16,32], index: 0, kind: input, shape index: {}]   ;;  %s1305_s1 = inlined_call_operand.hbm [shape: bf16[32,128], index: 1, kind: input, shape index: {}]   ;;  %s1306_s2 = inlined_call_operand.vmem [shape: f32[1,128], index: 2, kind: input, shape index: {}]   ;;  %s1307_s3 = inlined_call_operand.hbm [shape: bf16[128,128], index: 3, kind: input, shape index: {}]   ;;  %s1308_s4 = inlined_call_operand.vmem [shape: f32[1,128], index: 4, kind: input, shape index: {}]   ;;  %s1309_s5 = inlined_call_operand.hbm [shape: f32[16,128], index: 5, kind: output, shape index: {}]  }
   0x1   :  { %12 = vsyncpa [#allocation4 + $0x1], 0 }
   0x2   :  { %13 = vsyncpa [#allocation7], 0 }
   0x3   :  { %14 = vsyncpa [#allocation5], 0 }
   0x4   :  { %16 = vsyncpa [#allocation5 + $0x1], 0  ;;  %s1044_s18 = smov 0   ;;  %s1046_s19 = smov 0  }
   0x5   :  { %s1048_s20 = smov 0   ;;  %s1050_s21 = smov 0  }
   0x6   :  { %s1052_s22 = smov 0   ;;  %s1054_s23 = smov 0  }
   0x7 LB: > { %s660_s24 = sadd.s32 4294967295, %s1004_s23   ;;  %s661_s25 = sadd.s32 4294967294, %s1004_s23   ;;  %s1004_s23 = sphi %s1054_s23, %s22_s23   ;;  %s1000_s22 = sphi %s1052_s22, %s1331_s22   ;;  %s996_s21 = sphi %s1050_s21, %s1330_s21   ;;  %s992_s20 = sphi %s1048_s20, %s1329_s20   ;;  %s988_s19 = sphi %s1046_s19, %s1328_s19   ;;  %s984_s18 = sphi %s1044_s18, %s1327_s18  }
   0x8   : > { %p54_p0 = scmp.ne.s32.totalorder %s988_s19, %s984_s18  ;;  %p1078_p1 = scmp.eq.s32.totalorder %s660_s24, 0 }
   0x9   : > { %p1082_p2 = scmp.eq.s32.totalorder %s660_s24, 1  ;;  %p183_p3 = scmp.eq.s32.totalorder %s661_s25, 1 }
   0xa   : > { %s1314_s26 = scalar_select %p1078_p1, 1, 0 }
   0xb   : > { %p1088_p4 = por %p1078_p1, %p54_p0  ;;  %p662_p5 = scmp.ge.s32.totalorder %s1004_s23, 1 }
   0xc   : > { %p1093_p6 = por %p183_p3, %p54_p0  ;;  %p190_p7 = scmp.lt.s32.totalorder %s1004_s23, 3 }
   0xd   : > { %s1316_s28 = scalar_select %p1088_p4, 1, 0 }
   0xe   : > { %s1317_s29 = scalar_select %p1093_p6, 1, 0 }
   0xf   : > { %p1098_p8 = pnand %p662_p5, %p190_p7  ;;  %s1006_s6 = smov [#allocation6]  }
  0x10   : > { %s204_s7 = sshll.u32 %s1006_s6, 4  ;;  %s1007_s9 = smov [#allocation8]   ;;  %s1102_s7 = int_to_ptr.vmem [resolvable:$true] %s204_s7 }
  0x11   : > { %p743_p9 = pneg %p1098_p8  ;;  %s226_s10 = sshll.u32 %s1007_s9, 4  ;;  %s1113_s10 = int_to_ptr.vmem [resolvable:$true] %s226_s10 }
  0x12   : > { %s832_s13 = scalar_lea.hbm %s1305_s1, 256 }
  0x13   : > { %p1109_p11 = pnand %p743_p9, %p1078_p1  ;;  %p833_p12 = scmp.ne.s32.totalorder %s1305_s1, %s832_s13 }
  0x14   : > { %p839_p5 = scmp.lt.u32.totalorder %s832_s13, %s1305_s1 }
  0x15   : > { %p834_p13 = pneg %p1109_p11 }
  0x17   : > { %p835_p0 = pnand %p834_p13, %p833_p12 }
  0x19   : > { %p836_p3 = pneg %p835_p0 }
  0x1b   : > { %p841_p7 = pnand %p839_p5, %p836_p3 }
  0x1d   : > { %844 = shalt.err (!%p841_p7)
}
  0x1e   : > { %s845_s24 = scalar_lea.vmem %s1102_s7, 256  ;;  %p853_p1 = scmp.lt.s32.totalorder %s1102_s7, %s1102_s7 }
  0x1f   : > { %p846_p9 = scmp.ne.s32.totalorder %s1102_s7, %s845_s24  ;;  %p854_p12 = scmp.lt.s32.totalorder %s845_s24, %s845_s24 }
  0x21   : > { %p848_p10 = pnand %p846_p9, %p834_p13  ;;  %p855_p0 = por %p854_p12, %p853_p1 }
  0x23   : > { %p849_p6 = pneg %p848_p10 }
  0x25   : > { %p856_p4 = pnand %p855_p0, %p849_p6 }
  0x27   : > { %859 = shalt.err (!%p856_p4)
}
  0x28   : > { %s1008_s25 = smov 64   ;;  %s1009_s6 = smov 4  }
  0x29   : > { %746 = dma.hbm_to_vmem [thread:$0]  (!%p1109_p11), %s1305_s1, 256, %s1102_s7, [#allocation7], %s1008_s25, %s1008_s25, %s1009_s6  }
  0x2a   : > { %s860_s14 = scalar_lea.hbm %s1307_s3, 1024 }
  0x2b   : > { %p861_p1 = scmp.ne.s32.totalorder %s1307_s3, %s860_s14  ;;  %p867_p10 = scmp.lt.u32.totalorder %s860_s14, %s1307_s3 }
  0x2d   : > { %p863_p4 = pnand %p861_p1, %p834_p13 }
  0x2f   : > { %p864_p6 = pneg %p863_p4 }
  0x31   : > { %p869_p3 = pnand %p867_p10, %p864_p6 }
  0x33   : > { %872 = shalt.err (!%p869_p3)
}
  0x34   : > { %s873_s7 = scalar_lea.vmem %s1113_s10, 1024  ;;  %p881_p12 = scmp.lt.s32.totalorder %s1113_s10, %s1113_s10 }
  0x35   : > { %p874_p5 = scmp.ne.s32.totalorder %s1113_s10, %s873_s7  ;;  %p882_p0 = scmp.lt.s32.totalorder %s873_s7, %s873_s7 }
  0x37   : > { %p876_p7 = pnand %p874_p5, %p834_p13  ;;  %p883_p1 = por %p882_p0, %p881_p12 }
  0x39   : > { %p877_p9 = pneg %p876_p7 }
  0x3b   : > { %p884_p4 = pnand %p883_p1, %p877_p9 }
  0x3d   : > { %887 = shalt.err (!%p884_p4)
}
  0x3e   : > { %749 = dma.hbm_to_vmem [thread:$0]  (!%p1109_p11), %s1307_s3, 1024, %s1113_s10, [#allocation7], %s1008_s25, %s1008_s25, %s1009_s6  }
  0x3f   : > { %s34_s12 = sadd.s32 1, %s1000_s22  ;;  %s41_s13 = sadd.s32 1, %s992_s20 }
  0x40   : > { %p36_p13 = scmp.ge.s32.totalorder %s34_s12, 2  ;;  %p48_p6 = scmp.ne.s32.totalorder %s992_s20, %s988_s19 }
  0x41   : > { %p49_p10 = scmp.eq.s32.totalorder %s1004_s23, 0  ;;  %p760_p3 = scmp.lt.s32.totalorder %s1004_s23, 2 }
  0x42   : > { %s1333_s12 = smov (%p36_p13, %s34_s12), 0  ;;  %p1177_p7 = por %p1082_p2, %p48_p6 }
  0x43   : > { %p50_p5 = por %p49_p10, %p48_p6  ;;  %s38_s14 = ssub.s32 %s1000_s22, %s1333_s12 }
  0x44   : > { %s1320_s8 = scalar_select %p1177_p7, 1, 0 }
  0x45   : > { %s243_s15 = sand.u32 1, %s992_s20   ;;  %p39_p9 = scmp.eq.s32.totalorder %s38_s14, 0 }
  0x46   : > { %s667_s10 = sshll.u32 %s243_s15, 3  ;;  %s668_s25 = sshll.u32 %s1000_s22, 7 }
  0x47   : > { %s1186_s6 = scalar_select %p39_p9, %s992_s20, %s41_s13  }
  0x48   : > { %s1191_s24 = scalar_lea.hbm %s1304_s0, %s668_s25  ;;  %s247_s27 = scalar_lea.vmem [#allocation3], %s667_s10 }
  0x49   : > { %s254_s7 = sshll.u32 %s247_s27, 4  ;;  %p1195_p2 = pnand %p760_p3, %p50_p5  ;;  %s1199_s7 = int_to_ptr.vmem [resolvable:$true] %s254_s7 }
  0x4a   : > { %s244_s11 = scalar_lea.sflag [#allocation4], %s243_s15  ;;  %s888_s13 = scalar_lea.hbm %s1191_s24, 128 }
  0x4b   : > { %p889_p11 = scmp.ne.s32.totalorder %s1191_s24, %s888_s13  ;;  %p890_p12 = pneg %p1195_p2 }
  0x4c   : > { %s893_s25 = scalar_lea.hbm %s1304_s0, 256  ;;  %p894_p4 = scmp.lt.u32.totalorder %s1191_s24, %s1304_s0 }
  0x4d   : > { %p891_p0 = pnand %p890_p12, %p889_p11  ;;  %p895_p13 = scmp.lt.u32.totalorder %s893_s25, %s888_s13 }
  0x4e   : > { %p897_p10 = scmp.lt.u32.totalorder %s888_s13, %s1191_s24 }
  0x4f   : > { %p892_p1 = pneg %p891_p0  ;;  %p896_p6 = por %p895_p13, %p894_p4 }
  0x51   : > { %p898_p3 = por %p897_p10, %p896_p6 }
  0x53   : > { %p899_p5 = pnand %p898_p3, %p892_p1 }
  0x55   : > { %902 = shalt.err (!%p899_p5)
}
  0x56   : > { %s903_s15 = scalar_lea.vmem %s1199_s7, 128  ;;  %s1010_s27 = smov [#allocation3]  }
  0x57   : > { %p904_p9 = scmp.ne.s32.totalorder %s1199_s7, %s903_s15  ;;  %s908_s14 = sshll.u32 %s1010_s27, 4  ;;  %s909_s14 = int_to_ptr.vmem [resolvable:$false] %s908_s14 }
  0x58   : > { %s910_s10 = scalar_lea.vmem %s909_s14, 256  ;;  %p911_p7 = scmp.lt.s32.totalorder %s1199_s7, %s909_s14 }
  0x59   : > { %p906_p11 = pnand %p904_p9, %p890_p12  ;;  %p912_p4 = scmp.lt.s32.totalorder %s910_s10, %s903_s15 }
  0x5b   : > { %p907_p0 = pneg %p906_p11  ;;  %p913_p13 = por %p912_p4, %p911_p7 }
  0x5d   : > { %p914_p6 = pnand %p913_p13, %p907_p0 }
  0x5f   : > { %917 = shalt.err (!%p914_p6)
}
  0x60   : > { %753 = dma.hbm_to_vmem [thread:$0]  (!%p1195_p2), %s1191_s24, 128, %s1199_s7, %s244_s11  }
  0x61   : > { %263 = sbr.rel (%p1098_p8) target bundleno = 610 (0x262), region = 40  ;;  %s1229_s13 = sand.u32 (!%p1098_p8), 1, %s988_s19  }
  0x62   : > { %s670_s25 = sshll.u32 (!%p1098_p8), %s1229_s13, 3  ;;  %s266_s16 = scalar_lea.sflag (!%p1098_p8), [#allocation4], %s1229_s13 }
  0x63   : > { %s269_s17 = scalar_lea.vmem (!%p1098_p8), [#allocation3], %s670_s25  ;;  %p1322_p7 = scmp.ne.s32.totalorder (!%p1098_p8), %s1316_s28, 0 }
  0x68   : > { %971 = dma.done.wait (%p1322_p7), %s266_s16, 128  }
  0x69   : > { %973 = vsyncadd (%p1322_p7), %s266_s16, 4294967168  ;;  %p1323_p2 = scmp.ne.s32.totalorder %s1314_s26, 0 }
  0x6b   : > { %975 = dma.done.wait (%p1323_p2), [#allocation7], 1280  }
  0x6c   : > { %977 = vsyncadd (%p1323_p2), [#allocation7], 4294966016  ;;  %v1011_v0 = vmov 0.0   ;;  %vm1012_vm0 = vmmov 0   ;;  %v818_v1 = vld [vmem:[#allocation6] sm:$0xff]   ;;  %v819_v2 = vld [vmem:[#allocation6 + $0x8] sm:$0xff]  }
  0x6d   : > { %703 = vmatprep.subr.bf16.mxu0 %v1011_v0  ;;  %707 = vmatprep.mubr.msk.bf16.mxu0 %vm1012_vm0, %v1011_v0  ;;  %v317_v3 = vld [vmem:[%s269_s17] sm:$0xff]  ;;  %vm342_vm1 = vcmask 261120   ;;  %v822_v7 = vld [vmem:[#allocation8 + $0x10] sm:$0xff]   ;;  %v823_v8 = vld [vmem:[#allocation8 + $0x18] sm:$0xff]   ;;  %s688_s7 = sshll.u32 %s996_s21, 7  ;;  %s306_s9 = scalar_lea.vmem [#allocation9], %s670_s25 }
  0x6e   : > { %711 = vmatprep.subr.bf16.mxu1 %v1011_v0  ;;  %727 = vmatprep.mubr.msk.bf16.mxu1 %vm1012_vm0, %v1011_v0  ;;  %v318_v4 = vpack.c.bf16 %v317_v3, %v317_v3  ;;  %v820_v5 = vld [vmem:[#allocation8] sm:$0xff]   ;;  %v821_v6 = vld [vmem:[#allocation8 + $0x8] sm:$0xff]   ;;  %v826_v11 = vld [vmem:[#allocation8 + $0x30] sm:$0xff]   ;;  %s547_s11 = sshll.u32 %s306_s9, 4  ;;  %s1255_s14 = scalar_lea.hbm %s1309_s5, %s688_s7  ;;  %s1257_s11 = int_to_ptr.vmem [resolvable:$true] %s547_s11 }
  0x6f   : > { %704 = vmatpush3.bf16.msra.mxu0 %v818_v1  ;;  %712 = vmatpush3.bf16.msra.mxu1 %v820_v5  ;;  %v824_v9 = vld [vmem:[#allocation8 + $0x20] sm:$0xff]   ;;  %v825_v10 = vld [vmem:[#allocation8 + $0x28] sm:$0xff]   ;;  %v827_v12 = vld [vmem:[#allocation8 + $0x38] sm:$0xff]   ;;  %s534_s21 = scalar_lea.sflag [#allocation5], %s1229_s13  ;;  %s918_s10 = scalar_lea.vmem %s1257_s11, 128 }
  0x70   : > { %705 = vmatprep.subr.bf16.mxu0 %v1011_v0  ;;  %713 = vmatprep.subr.bf16.mxu1 %v1011_v0  ;;  %v674_v13 = vld [vmem:[%s1306_s2] ss:$0 sm:$0xff]  ;;  %p919_p8 = scmp.ne.s32.totalorder %s1257_s11, %s918_s10  ;;  %p1324_p12 = scmp.ne.s32.totalorder %s1320_s8, 0 }
  0x71   : > { %v686_v45 = vld [vmem:[%s1308_s4] ss:$0 sm:$0xff]  ;;  %s1013_s25 = smov [#allocation9]  }
  0x72   : > { %p920_p1 = pnand %p919_p8, %p1324_p12  ;;  %s922_s16 = sshll.u32 %s1013_s25, 4  ;;  %s923_s16 = int_to_ptr.vmem [resolvable:$false] %s922_s16 }
  0x73   : > { %706 = vmatpush3.bf16.msra.mxu0 %v819_v2  ;;  %714 = vmatpush3.bf16.msra.mxu1 %v821_v6  ;;  %s924_s17 = scalar_lea.vmem %s923_s16, 256  ;;  %p925_p3 = scmp.lt.s32.totalorder %s1257_s11, %s923_s16 }
  0x74   : > { %715 = vmatprep.subr.bf16.mxu1 %v1011_v0  ;;  %p921_p10 = pneg %p920_p1  ;;  %p926_p5 = scmp.lt.s32.totalorder %s924_s17, %s918_s10 }
  0x76   : > { %708 = vmatmul.mubr.msk.bf16.vlgmr.msra.gmra.mrb[0].mxu0 %vm342_vm1, %v318_v4  ;;  %p927_p9 = por %p926_p5, %p925_p3 }
  0x77   : > { %716 = vmatpush3.bf16.msra.mxu1 %v822_v7 }
  0x78   : > { %717 = vmatprep.subr.bf16.mxu1 %v1011_v0  ;;  %p928_p11 = pnand %p927_p9, %p921_p10 }
  0x7b   : > { %718 = vmatpush3.bf16.msra.mxu1 %v823_v8 }
  0x7c   : > { %719 = vmatprep.subr.bf16.mxu1 %v1011_v0 }
  0x7f   : > { %720 = vmatpush3.bf16.msra.mxu1 %v824_v9 }
  0x80   : > { %721 = vmatprep.subr.bf16.mxu1 %v1011_v0 }
  0x83   : > { %722 = vmatpush3.bf16.msra.mxu1 %v825_v10 }
  0x84   : > { %723 = vmatprep.subr.bf16.mxu1 %v1011_v0 }
  0x87   : > { %724 = vmatpush3.bf16.msra.mxu1 %v826_v11 }
  0x88   : > { %725 = vmatprep.subr.bf16.mxu1 %v1011_v0 }
  0x8b   : > { %726 = vmatpush3.bf16.msra.mxu1 %v827_v12 }
 0x149   : > { %v380_v14 = vpop.f32.mrb[0].mxu0 }
 0x14a   : > { %v381_v15 = vadd.f32 %v674_v13, %v380_v14  ;;  %v709_v16 = vpop.f32.mrb[1].mxu0 }
 0x14b   : > { %v383_v17 = vpop.f32.mrb[2].mxu0 }
 0x14c   : > { %v387_v18 = vmul.f32 0.70710677, %v381_v15  ;;  %v710_v19 = vpop.f32.mrb[3].mxu0  ;;  %v386_v41 = vmul.f32 0.5, %v381_v15 }
 0x14e   : > { %v388_v20 = vand.u32 2147483647, %v387_v18  ;;  %vm407_vm2 = vcmp.ge.f32.partialorder %v387_v18, 0.0 }
 0x150   : > { %v389_v21 = vmul.f32 0.3275911, %v388_v20  ;;  %v401_v23 = vsub.f32 0.0, %v388_v20 }
 0x152   : > { %v390_v22 = vadd.f32 1.0, %v389_v21  ;;  %v402_v25 = vmul.f32 %v401_v23, %v388_v20 }
 0x154   : > { %828 = vrcp.f32 %v390_v22  ;;  %v403_v28 = vmul.f32 1.442695, %v402_v25 }
 0x156   : > { %830 = vpow2.f32 %v403_v28 }
 0x15e   : > { %v829_v24 = vpop.eup %828 }
 0x15f   : > { %v392_v26 = vmul.f32 1.0614054, %v829_v24 }
 0x160   : > { %v831_v36 = vpop.eup %830 }
 0x161   : > { %v393_v27 = vadd.f32 -1.4531521, %v392_v26 }
 0x163   : > { %v394_v29 = vmul.f32 %v829_v24, %v393_v27 }
 0x165   : > { %v395_v30 = vadd.f32 1.4214138, %v394_v29 }
 0x167   : > { %v396_v31 = vmul.f32 %v829_v24, %v395_v30 }
 0x169   : > { %v397_v32 = vadd.f32 -0.28449672, %v396_v31 }
 0x16b   : > { %v398_v33 = vmul.f32 %v829_v24, %v397_v32 }
 0x16d   : > { %v399_v34 = vadd.f32 0.2548296, %v398_v33 }
 0x16f   : > { %v400_v35 = vmul.f32 %v829_v24, %v399_v34 }
 0x171   : > { %v405_v37 = vmul.f32 %v831_v36, %v400_v35 }
 0x173   : > { %v406_v38 = vsub.f32 1.0, %v405_v37 }
 0x175   : > { %v408_v39 = vsub.f32 0.0, %v406_v38 }
 0x177   : > { %v409_v40 = vsel %vm407_vm2, %v406_v38, %v408_v39 }
 0x178   : > { %v410_v42 = vadd.f32 1.0, %v409_v40 }
 0x17a   : > { %v411_v43 = vmul.f32 %v410_v42, %v386_v41 }
 0x17c   : > { %v413_v44 = vpack.c.bf16 %v411_v43, %v411_v43 }
 0x17e   : > { %728 = vmatmul.mubr.bf16.vlgmr.msra.gmra.mrb[0].mxu1 %v413_v44 }
 0x251   : > { %v512_v46 = vpop.f32.mrb[0].mxu1 }
 0x252   : > { %v531_v47 = vadd.f32 %v686_v45, %v512_v46  ;;  %v729_v48 = vpop.f32.mrb[1].mxu1 }
 0x253   : > { %v515_v49 = vpop.f32.mrb[2].mxu1 }
 0x254   : > { %532 = vst [vmem:[%s306_s9] sm:$0xff] %v531_v47  ;;  %v730_v50 = vpop.f32.mrb[3].mxu1 }
 0x255   : > { %931 = shalt.err (!%p928_p11)
}
 0x256   : > { %s932_s13 = scalar_lea.hbm %s1255_s14, 128  ;;  %s936_s30 = scalar_lea.hbm %s1309_s5, 256 }
 0x257   : > { %p933_p0 = scmp.ne.s32.totalorder %s1255_s14, %s932_s13  ;;  %p937_p6 = scmp.lt.u32.totalorder %s1255_s14, %s1309_s5 }
 0x258   : > { %p938_p7 = scmp.lt.u32.totalorder %s936_s30, %s932_s13  ;;  %p940_p8 = scmp.lt.u32.totalorder %s932_s13, %s1255_s14 }
 0x259   : > { %p934_p4 = pnand %p933_p0, %p1324_p12 }
 0x25a   : > { %p939_p2 = por %p938_p7, %p937_p6 }
 0x25b   : > { %p935_p13 = pneg %p934_p4 }
 0x25c   : > { %p941_p1 = por %p940_p8, %p939_p2 }
 0x25e   : > { %p942_p10 = pnand %p941_p1, %p935_p13 }
 0x260   : > { %945 = shalt.err (!%p942_p10)
}
 0x261   : > { %741 = dma.vmem_to_hbm [thread:$0]  (%p1324_p12), %s1257_s11, 128, %s1255_s14, %s534_s21  }
 0x262 PF: > { %s559_s9 = sand.u32 1, %s984_s18   ;;  %p1325_p3 = scmp.ne.s32.totalorder %s1317_s29, 0 }
 0x263   : > { %p1326_p5 = scmp.ge.s32.totalorder %s1004_s23, 2  ;;  %s560_s15 = scalar_lea.sflag [#allocation5], %s559_s9 }
 0x265   : > { %p755_p9 = pnand %p1326_p5, %p1325_p3 }
 0x267   : > { %979 = dma.done.wait (!%p755_p9), %s560_s15, 128  }
 0x268   : > { %981 = vsyncadd (!%p755_p9), %s560_s15, 4294967168  ;;  %s22_s23 = sadd.s32 1, %s1004_s23   ;;  %s1327_s18 = smov %s988_s19 }
 0x269   : > { %p19_p11 = scmp.ge.s32.totalorder %s22_s23, 4   ;;  %s1328_s19 = smov %s992_s20 }
 0x26a   : > { %s1329_s20 = smov %s1186_s6  ;;  %s1330_s21 = smov %s1000_s22 }
 0x26b   : > { %s1331_s22 = smov %s1333_s12  ;;  %21 = sbr.rel (!%p19_p11) target bundleno = 7 (0x7), region = 106 }
 0x272   :  { %565 = vsyncpa [#allocation4], 1 }
 0x273   :  { %567 = vsyncpa [#allocation4 + $0x1], 1 }
 0x274   :  { %568 = vsyncpa [#allocation7], 1 }
 0x275   :  { %569 = vsyncpa [#allocation5], 1 }
 0x276   :  { %571 = vsyncpa [#allocation5 + $0x1], 1 }

</bundles_post_ra>
